<compile_context>
chip_gen: v7x
topology: tpu7x:2x2x1
jax: 0.10.0
libtpu: 0.0.40
codegen_flags: <defaults>
</compile_context>

<pallas_src>
import functools

import jax
import jax.numpy as jnp
from jax.experimental import pallas as pl
from jax.experimental.pallas import tpu as pltpu

LANES = 128            # vreg lane width
ROW_TILE = 8           # f32 sublane alignment
MAX_BLOCK_ROWS = 1024  # (1024, 128) f32 block = 512 KiB per stream
NUM_SPLITS = 2         # leading "parallel" grid axis of the reduction path
PAD_LOGIT = -1.0e4     # BCE_with_logits(PAD_LOGIT, 0) == 0.0 exactly in f32


# ---------------------------------------------------------------------------
# Kernels
# ---------------------------------------------------------------------------
def _stable_bce(x, t):
    # max(x,0) - x*t + log1p(exp(-|x|)); written with log(1+.) which lowers
    # unconditionally on TPU (same 2 EUP ops, negligible precision delta).
    return jnp.maximum(x, 0.0) - x * t + jnp.log(1.0 + jnp.exp(-jnp.abs(x)))


def _bce_sum_kernel(x_ref, t_ref, out_ref):
    """Accumulate elementwise BCE into a lane-dense VMEM-resident output block.

    Grid is (NUM_SPLITS, tiles_per_split); the output block depends only on the
    leading (parallel) axis, so it stays resident in VMEM across the inner
    (arbitrary) reduction axis. Per-step work is pure VPU/EUP — the cross-lane
    reduction happens once, outside the kernel.
    """
    @pl.when(pl.program_id(1) == 0)
    def _():
        out_ref[...] = jnp.zeros_like(out_ref)

    x = x_ref[...].astype(jnp.float32)
    t = t_ref[...].astype(jnp.float32)
    out_ref[...] += _stable_bce(x, t)


def _bce_elementwise_kernel(x_ref, t_ref, o_ref):
    """Per-element BCE(sigmoid(x), t) for reduction='none'."""
    x = x_ref[...].astype(jnp.float32)
    t = t_ref[...].astype(jnp.float32)
    o_ref[...] = _stable_bce(x, t)


# ---------------------------------------------------------------------------
# Wrapper
# ---------------------------------------------------------------------------
def _round_up(a, b):
    return -(-a // b) * b


def _flatten_pad(x, rows_total, pad_value):
    """Flatten to (rows_total, 128), padding the tail with `pad_value`."""
    flat = x.reshape(-1)
    n_pad = rows_total * LANES - flat.shape[0]
    flat = jnp.pad(flat, (0, n_pad), constant_values=pad_value)
    return flat.reshape(rows_total, LANES)


@functools.partial(jax.jit, static_argnames=("reduction", "ignore_index"))
def bce_loss(inp, target, reduction="mean", ignore_index=None):
    """Pallas implementation of the custom BCELoss.forward.

    Sigmoid is applied to `inp` inside the kernel (fused, stable logits form),
    matching the PyTorch module's `sigmoid + log` math for unsaturated inputs
    and staying finite where the original would produce inf/NaN.
    """
    # NOTE: the original module uses a truthy check (`if self.ignore_index:`),
    # which silently skips ignore_index=0; `is not None` is the intended
    # semantics and identical for the default (None) and positive values.
    if ignore_index is not None:
        inp = inp[:, :ignore_index, ...]
        target = target[:, :ignore_index, ...]

    if reduction not in ("none", "mean", "sum"):
        raise ValueError(
            f'Unsupported reduction: {reduction}, available options are '
            '["mean", "sum", "none"].'
        )

    orig_shape = inp.shape
    n_valid = int(inp.size)  # static under jit (shape-derived)

    # Block sizing: as many 8-row tiles as needed, capped at (1024, 128).
    rows_needed = _round_up(max(-(-max(n_valid, 1) // LANES), 1), ROW_TILE)
    block_rows = min(MAX_BLOCK_ROWS, rows_needed)

    if reduction == "none":
        n_tiles = -(-rows_needed // block_rows)
        rows_total = n_tiles * block_rows
        x2d = _flatten_pad(inp, rows_total, PAD_LOGIT)
        t2d = _flatten_pad(target, rows_total, 0)

        loss2d = pl.pallas_call(
            _bce_elementwise_kernel,
            out_shape=jax.ShapeDtypeStruct((rows_total, LANES), jnp.float32),
            grid_spec=pltpu.PrefetchScalarGridSpec(
                num_scalar_prefetch=0,
                grid=(n_tiles,),
                in_specs=[
                    pl.BlockSpec((block_rows, LANES), lambda i: (i, 0)),
                    pl.BlockSpec((block_rows, LANES), lambda i: (i, 0)),
                ],
                out_specs=pl.BlockSpec((block_rows, LANES), lambda i: (i, 0)),
            ),
            compiler_params=pltpu.CompilerParams(
                dimension_semantics=("parallel",)
            ),
        )(x2d, t2d)

        if rows_total * LANES == n_valid:
            # No padding was added: avoid an extra full-array slice pass.
            return loss2d.reshape(orig_shape)
        return loss2d.reshape(-1)[:n_valid].reshape(orig_shape)

    # 'mean' / 'sum': 2-D grid, NUM_SPLITS parallel partials (maps to the two
    # TensorCores on v7x), reduction axis innermost ("arbitrary").
    n_tiles = _round_up(-(-rows_needed // block_rows), NUM_SPLITS)
    tiles_per_split = n_tiles // NUM_SPLITS
    rows_total = n_tiles * block_rows
    x2d = _flatten_pad(inp, rows_total, PAD_LOGIT)  # padded loss == 0 exactly
    t2d = _flatten_pad(target, rows_total, 0)

    in_map = lambda i, j: (i * tiles_per_split + j, 0)

    partials = pl.pallas_call(
        _bce_sum_kernel,
        out_shape=jax.ShapeDtypeStruct(
            (NUM_SPLITS * block_rows, LANES), jnp.float32
        ),
        grid_spec=pltpu.PrefetchScalarGridSpec(
            num_scalar_prefetch=0,
            grid=(NUM_SPLITS, tiles_per_split),
            in_specs=[
                pl.BlockSpec((block_rows, LANES), in_map),
                pl.BlockSpec((block_rows, LANES), in_map),
            ],
            out_specs=pl.BlockSpec((block_rows, LANES), lambda i, j: (i, 0)),
        ),
        compiler_params=pltpu.CompilerParams(
            dimension_semantics=("parallel", "arbitrary")
        ),
    )(x2d, t2d)

    total = jnp.sum(partials)  # tiny one-shot reduce of the per-lane partials
    if reduction == "mean":
        return total / jnp.float32(n_valid)
    return total  # 'sum'


# ---------------------------------------------------------------------------
# Reference (pure JAX, mirrors the PyTorch module) for sanity check
# ---------------------------------------------------------------------------
def bce_loss_ref(inp, target, reduction="mean"):
    p = jax.nn.sigmoid(inp.astype(jnp.float32))
    t = target.astype(jnp.float32)
    loss = -(t * jnp.log(p) + (1.0 - t) * jnp.log(1.0 - p))
    if reduction == "mean":
        return loss.mean()
    if reduction == "sum":
        return loss.sum()
    return loss


if __name__ == "__main__":
    key = jax.random.PRNGKey(0)
    k1, k2, k3, k4 = jax.random.split(key, 4)

    # NCHW-like logits and binary targets.
    x = jax.random.normal(k1, (2, 4, 16, 16), dtype=jnp.float32)
    t = jax.random.bernoulli(k2, 0.5, (2, 4, 16, 16)).astype(jnp.float32)

    out_mean = jax.block_until_ready(bce_loss(x, t, reduction="mean"))
    out_sum = jax.block_until_ready(bce_loss(x, t, reduction="sum"))
    out_none = jax.block_until_ready(bce_loss(x, t, reduction="none"))

    assert jnp.allclose(out_mean, bce_loss_ref(x, t, "mean"), rtol=1e-4, atol=1e-5)
    assert jnp.allclose(out_sum, bce_loss_ref(x, t, "sum"), rtol=1e-4, atol=1e-2)
    assert out_none.shape == x.shape
    assert jnp.allclose(out_none, bce_loss_ref(x, t, "none"), rtol=1e-4, atol=1e-5)

    # Odd (non-128-multiple) shape to exercise the padding path.
    x2 = jax.random.normal(k3, (3, 5, 7, 11), dtype=jnp.float32)
    t2 = jax.random.bernoulli(k4, 0.5, (3, 5, 7, 11)).astype(jnp.float32)

    out_mean2 = jax.block_until_ready(bce_loss(x2, t2, reduction="mean"))
    out_none2 = jax.block_until_ready(bce_loss(x2, t2, reduction="none"))

    assert jnp.allclose(out_mean2, bce_loss_ref(x2, t2, "mean"), rtol=1e-4, atol=1e-5)
    assert out_none2.shape == x2.shape
    assert jnp.allclose(out_none2, bce_loss_ref(x2, t2, "none"), rtol=1e-4, atol=1e-5)

    print("KERNEL_OK")
</pallas_src>

<mosaic_0001>
module attributes {stable_mosaic.version = 11 : i64} {
  func.func @_bce_sum_kernel(%arg0: i32, %arg1: i32, %arg2: memref<16x128xf32, #tpu.memory_space<vmem>>, %arg3: memref<16x128xf32, #tpu.memory_space<vmem>>, %arg4: memref<16x128xf32, #tpu.memory_space<vmem>>) attributes {dimension_semantics = [#tpu.dimension_semantics<parallel>, #tpu.dimension_semantics<arbitrary>], iteration_bounds = array<i64: 2, 1>, scalar_prefetch = 0 : i64, scratch_operands = 0 : i64, tpu.core_type = #tpu.core_type<tc>, window_params = [{transform_indices = @transform_0, window_bounds = array<i64: 16, 128>}, {transform_indices = @transform_1, window_bounds = array<i64: 16, 128>}, {transform_indices = @transform_2, window_bounds = array<i64: 16, 128>}]} {
    %c0_i32 = arith.constant 0 : i32
    %0 = arith.cmpi eq, %arg1, %c0_i32 : i32
    %1 = arith.extui %0 : i1 to i32
    %c0_i32_0 = arith.constant 0 : i32
    %2 = arith.cmpi ne, %1, %c0_i32_0 : i32
    scf.if %2 {
      %cst_10 = arith.constant 0.000000e+00 : f32
      %20 = vector.broadcast %cst_10 : f32 to vector<16x128xf32>
      %c0_11 = arith.constant 0 : index
      %c0_12 = arith.constant 0 : index
      %21 = vector.load %arg4[%c0_11, %c0_12] : memref<16x128xf32, #tpu.memory_space<vmem>>, vector<16x128xf32>
      tpu.vector_store %arg4[%c0_11, %c0_12], %20 {strides = array<i32>} : memref<16x128xf32, #tpu.memory_space<vmem>>, vector<16x128xf32>,
    } else {
    }
    %c0 = arith.constant 0 : index
    %c0_1 = arith.constant 0 : index
    %3 = vector.load %arg2[%c0, %c0_1] : memref<16x128xf32, #tpu.memory_space<vmem>>, vector<16x128xf32>
    %c0_2 = arith.constant 0 : index
    %c0_3 = arith.constant 0 : index
    %4 = vector.load %arg3[%c0_2, %c0_3] : memref<16x128xf32, #tpu.memory_space<vmem>>, vector<16x128xf32>
    %c0_4 = arith.constant 0 : index
    %c0_5 = arith.constant 0 : index
    %5 = vector.load %arg4[%c0_4, %c0_5] : memref<16x128xf32, #tpu.memory_space<vmem>>, vector<16x128xf32>
    %cst = arith.constant 0.000000e+00 : f32
    %6 = vector.broadcast %cst : f32 to vector<16x128xf32>
    %7 = arith.maximumf %3, %6 : vector<16x128xf32>
    %8 = arith.mulf %3, %4 : vector<16x128xf32>
    %9 = arith.subf %7, %8 : vector<16x128xf32>
    %10 = math.absf %3 : vector<16x128xf32>
    %cst_6 = arith.constant 0.000000e+00 : f32
    %11 = vector.broadcast %cst_6 : f32 to vector<16x128xf32>
    %12 = arith.subf %11, %10 : vector<16x128xf32>
    %13 = math.exp %12 : vector<16x128xf32>
    %cst_7 = arith.constant 1.000000e+00 : f32
    %14 = vector.broadcast %cst_7 : f32 to vector<16x128xf32>
    %15 = arith.addf %14, %13 : vector<16x128xf32>
    %16 = math.log %15 : vector<16x128xf32>
    %17 = arith.addf %9, %16 : vector<16x128xf32>
    %18 = arith.addf %5, %17 : vector<16x128xf32>
    %c0_8 = arith.constant 0 : index
    %c0_9 = arith.constant 0 : index
    %19 = vector.load %arg4[%c0_8, %c0_9] : memref<16x128xf32, #tpu.memory_space<vmem>>, vector<16x128xf32>
    tpu.vector_store %arg4[%c0_8, %c0_9], %18 {strides = array<i32>} : memref<16x128xf32, #tpu.memory_space<vmem>>, vector<16x128xf32>,
    return
  }
  func.func @transform_0(%arg0: i32, %arg1: i32) -> (i32, i32) {
    %c1_i32 = arith.constant 1 : i32
    %0 = arith.muli %arg0, %c1_i32 : i32
    %1 = arith.addi %0, %arg1 : i32
    %c0_i32 = arith.constant 0 : i32
    %c0_i32_0 = arith.constant 0 : i32
    return %1, %c0_i32 : i32, i32
  }
  func.func @transform_1(%arg0: i32, %arg1: i32) -> (i32, i32) {
    %c1_i32 = arith.constant 1 : i32
    %0 = arith.muli %arg0, %c1_i32 : i32
    %1 = arith.addi %0, %arg1 : i32
    %c0_i32 = arith.constant 0 : i32
    %c0_i32_0 = arith.constant 0 : i32
    return %1, %c0_i32 : i32, i32
  }
  func.func @transform_2(%arg0: i32, %arg1: i32) -> (i32, i32) {
    %c0_i32 = arith.constant 0 : i32
    %c0_i32_0 = arith.constant 0 : i32
    return %arg0, %c0_i32 : i32, i32
  }
}

</mosaic_0001>

<bundles_post_ra>
// kernel: bce_loss.1
= control target key start
LH: loop header
LB: loop body
LE: loop exit
PB: predicated region body
PF: predicated region fallthrough
CT: control target
= control target key end

     0   :  { %s396_s9 = smov 0   ;;  %s398_s10 = smov 0   ;;  %s439_s0 = inlined_call_operand.vmem [shape: f32[32,128], index: 0, kind: input, shape index: {}]   ;;  %s440_s1 = inlined_call_operand.vmem [shape: f32[32,128], index: 1, kind: input, shape index: {}]   ;;  %s441_s2 = inlined_call_operand.vmem [shape: f32[32,128], index: 2, kind: output, shape index: {}]  }
   0x1   :  { %s400_s11 = smov 0  }
   0x2 LB: > { %s24_s12 = sadd.s32 1, %s374_s10  ;;  %p314_p0 = scmp.ge.s32.totalorder %s378_s11, 1  ;;  %s378_s11 = sphi %s400_s11, %s12_s11   ;;  %s374_s10 = sphi %s398_s10, %s443_s10   ;;  %s370_s9 = sphi %s396_s9, %s442_s9  }
   0x3   : > { %p26_p1 = scmp.ge.s32.totalorder %s24_s12, 2  ;;  %p144_p2 = scmp.lt.s32.totalorder %s378_s11, 3 }
   0x5   : > { %s445_s12 = smov (%p26_p1, %s24_s12), 0  ;;  %p145_p3 = pnand %p314_p0, %p144_p2 }
   0x6   : > { %s315_s13 = sshll.u32 (!%p145_p3), %s370_s9, 1  ;;  %v380_v2 = vmov (!%p145_p3), 0.0  }
   0x7   : > { %148 = sbr.rel (%p145_p3) target bundleno = 55 (0x37), region = 28  ;;  %p175_p4 = scmp.lt.s32.totalorder (!%p145_p3), %s315_s13, 3 }
   0xe   : > { %s447_s13 = smov (!%p175_p4, %s315_s13), 3 }
   0xf   : > { %s316_s14 = sshll.u32 %s447_s13, 3 }
  0x10   : > { %s178_s17 = scalar_lea.vmem %s439_s0, %s316_s14  ;;  %s420_s20 = scalar_lea.vmem %s441_s2, %s316_s14 }
  0x11   : > { %v201_v0 = vld [vmem:[%s178_s17] sm:$0xff]  ;;  %v202_v1 = vld [vmem:[%s178_s17 + $0x8] sm:$0xff]  ;;  %199 = vst [vmem:[%s420_s20] sm:$0xff] %v380_v2  ;;  %200 = vst [vmem:[%s420_s20 + $0x8] sm:$0xff] %v380_v2  ;;  %s186_s23 = scalar_lea.vmem %s440_s1, %s316_s14 }
  0x12   : > { %v213_v3 = vand.u32 2147483647, %v201_v0  ;;  %v214_v4 = vand.u32 2147483647, %v202_v1  ;;  %v203_v13 = vld [vmem:[%s186_s23] sm:$0xff]  ;;  %v204_v14 = vld [vmem:[%s186_s23 + $0x8] sm:$0xff] }
  0x13   : > { %v209_v15 = vmul.f32 %v203_v13, %v201_v0  ;;  %v207_v16 = vmax.f32 %v201_v0, 0.0  ;;  %v208_v17 = vmax.f32 %v202_v1, 0.0  ;;  %v210_v18 = vmul.f32 %v204_v14, %v202_v1 }
  0x14   : > { %v215_v5 = vsub.f32 0.0, %v213_v3  ;;  %v216_v6 = vsub.f32 0.0, %v214_v4 }
  0x15   : > { %v211_v19 = vsub.f32 %v207_v16, %v209_v15  ;;  %v212_v21 = vsub.f32 %v208_v17, %v210_v18 }
  0x16   : > { %v217_v7 = vmul.f32 1.442695, %v215_v5  ;;  %v219_v8 = vmul.f32 1.442695, %v216_v6 }
  0x18   : > { %348 = vpow2.f32 %v217_v7  ;;  %v205_v24 = vld [vmem:[%s420_s20] sm:$0xff] }
  0x19   : > { %350 = vpow2.f32 %v219_v8 }
  0x22   : > { %v349_v9 = vpop.eup %348 }
  0x23   : > { %v351_v10 = vpop.eup %350  ;;  %v221_v11 = vadd.f32 1.0, %v349_v9 }
  0x24   : > { %v222_v12 = vadd.f32 1.0, %v351_v10 }
  0x25   : > { %352 = vlog2.f32 %v221_v11 }
  0x26   : > { %354 = vlog2.f32 %v222_v12 }
  0x2f   : > { %v353_v20 = vpop.eup %352 }
  0x30   : > { %v355_v22 = vpop.eup %354  ;;  %v224_v23 = vmul.f32 0.6931472, %v353_v20 }
  0x31   : > { %v226_v25 = vmul.f32 0.6931472, %v355_v22 }
  0x32   : > { %v227_v26 = vadd.f32 %v224_v23, %v211_v19 }
  0x33   : > { %v228_v27 = vadd.f32 %v226_v25, %v212_v21 }
  0x34   : > { %v229_v28 = vadd.f32 %v227_v26, %v205_v24 }
  0x35   : > { %232 = vst [vmem:[%s420_s20 + $0x8] sm:$0xff] %v228_v27 }
  0x36   : > { %231 = vst [vmem:[%s420_s20] sm:$0xff] %v229_v28 }
  0x37 PF: > { %s12_s11 = sadd.s32 1, %s378_s11   ;;  %s442_s9 = smov %s374_s10 }
  0x38   : > { %p9_p5 = scmp.ge.s32.totalorder %s12_s11, 4   ;;  %s443_s10 = smov %s445_s12 }
  0x3a   :  { %11 = sbr.rel (!%p9_p5) target bundleno = 2 (0x2), region = 65 }

</bundles_post_ra>
